<compile_context>
chip_gen: v7x
topology: tpu7x:2x2x1
jax: 0.10.0
libtpu: 0.0.40
codegen_flags: <defaults>
</compile_context>

<pallas_src>
import functools

import jax
import jax.numpy as jnp
from jax.experimental import pallas as pl
from jax.experimental.pallas import tpu as pltpu


def _round_up(x, m):
    return -(-x // m) * m


def _causal_dilated_conv_kernel(halo_ref, x_ref, w_ref, o_ref, *,
                                kernel_size, dilation, halo_rows, block_rows,
                                matmul_dtype):
    """One (block_rows, C_in_pad) time slab of one sequence.

    halo_ref : (1, HB, Cin_p)    rows immediately before the current block
                                 (zeroed in-kernel for the first block).
    x_ref    : (1, TB, Cin_p)    current block.
    w_ref    : (K*Cin_p, Cout_p) fused tap weights (tap-major rows), already
                                 in matmul_dtype.
    o_ref    : (1, TB, Cout_p)
    """
    i = pl.program_id(1)

    # Cast once, right after load: bf16 MXU operands on v6e/v7x, f32 accumulate.
    halo = halo_ref[0].astype(matmul_dtype)            # (HB, Cin_p)
    x = x_ref[0].astype(matmul_dtype)                  # (TB, Cin_p)

    # First time block: causal history is all zeros (halo ref then holds a
    # clamped, meaningless block -> kill it with a scalar broadcast multiply).
    halo = halo * (i > 0).astype(matmul_dtype)

    # Build the K dilated-tap slabs directly from halo-tail + x-head (no big
    # (HB+TB, C) window copy). Tap j reads time t - (K-1-j)*d.
    taps = []
    for j in range(kernel_size):
        shift = (kernel_size - 1 - j) * dilation       # static
        if shift == 0:
            taps.append(x)
        elif shift >= block_rows:                      # shift == HB == TB
            taps.append(halo[halo_rows - shift:, :])
        else:
            taps.append(jnp.concatenate(
                [halo[halo_rows - shift:, :], x[:block_rows - shift, :]],
                axis=0))

    # Channels are padded to a multiple of 128 lanes, so this axis=1 concat is
    # pure vreg placement (no cross-lane shuffles).
    x_cat = taps[0] if kernel_size == 1 else jnp.concatenate(taps, axis=1)

    y = jnp.dot(x_cat, w_ref[...],
                preferred_element_type=jnp.float32)    # (TB, Cout_p) f32
    o_ref[0] = y.astype(o_ref.dtype)


def dilated_conv_block(x_nct, w_oik, dilation, *,
                       target_block_rows=1024, matmul_dtype=None):
    """x_nct: (N, C_in, T); w_oik: PyTorch Conv1d weight (C_out, C_in, K).

    Returns the causal dilated conv output in (N, C_out, T) layout.
    """
    n, c_in, t = x_nct.shape
    c_out, c_in_w, k = w_oik.shape
    assert c_in_w == c_in

    if matmul_dtype is None:
        # bf16 MXU operands by default (f32 accumulation); v6e/v7x peak is bf16.
        matmul_dtype = (jnp.bfloat16 if x_nct.dtype == jnp.float32
                        else x_nct.dtype)
    matmul_dtype = jnp.dtype(matmul_dtype)
    store_dtype = jnp.dtype(x_nct.dtype)

    # Lane-dense channel widths.
    c_in_p = _round_up(c_in, 128)
    c_out_p = _round_up(c_out, 128)

    pad = (k - 1) * dilation                      # causal history length
    sub_of = {4: 8, 2: 16, 1: 32}
    sub = max(sub_of[store_dtype.itemsize], sub_of[matmul_dtype.itemsize])
    hb = max(sub, _round_up(pad, sub))            # halo rows: >= pad, aligned
    tb = max(hb, (max(target_block_rows, hb) // hb) * hb)
    tb = min(tb, _round_up(t, hb))                # no bigger than needed

    in_b, out_b, mm_b = (store_dtype.itemsize, store_dtype.itemsize,
                         matmul_dtype.itemsize)

    def footprint(tb_):
        tiles = 2 * ((hb + tb_) * c_in_p * in_b + tb_ * c_out_p * out_b)
        weights = 2 * k * c_in_p * c_out_p * mm_b
        temps = 2 * k * tb_ * c_in_p * mm_b + tb_ * c_out_p * 4
        return tiles + weights + temps

    budget = 48 * 1024 * 1024       # fits v7x's 64 MiB VMEM with headroom
    headroom = 8 * 1024 * 1024
    while tb > hb and footprint(tb) + headroom > budget:
        tb = max(hb, ((tb // 2) // hb) * hb)

    num_tb = -(-t // tb)
    t_r = num_tb * tb
    ratio = tb // hb

    # channels-last; one pad copy: time padded (right) to whole blocks and
    # channels padded to 128-lane width. No left zero pad needed (the first
    # block's halo is zeroed inside the kernel).
    # TODO(synk): a full WaveNet stack should keep activations in (N, T, C_pad)
    #             across layers to drop these transpose/pad HBM passes.
    x_ntc = jnp.transpose(x_nct, (0, 2, 1))                         # (N, T, Cin)
    x_pad = jnp.pad(x_ntc, ((0, 0), (0, t_r - t), (0, c_in_p - c_in)))

    # (C_out, C_in, K) -> (K, Cin_p, Cout_p) -> (K*Cin_p, Cout_p), tap-major
    # rows matching x_cat's columns; cast to the MXU operand dtype once here.
    w_kic = jnp.transpose(w_oik, (2, 1, 0))
    w_kic = jnp.pad(w_kic, ((0, 0), (0, c_in_p - c_in), (0, c_out_p - c_out)))
    w_flat = w_kic.reshape(k * c_in_p, c_out_p).astype(matmul_dtype)

    kernel = functools.partial(
        _causal_dilated_conv_kernel,
        kernel_size=k, dilation=dilation,
        halo_rows=hb, block_rows=tb, matmul_dtype=matmul_dtype)

    vmem_limit = int(min(budget,
                         max(32 * 1024 * 1024, footprint(tb) + headroom)))

    out = pl.pallas_call(
        kernel,
        out_shape=jax.ShapeDtypeStruct((n, t_r, c_out_p), store_dtype),
        grid=(n, num_tb),
        in_specs=[
            # halo: the hb rows right before the current block (hb-unit blocks);
            # clamped to block 0 for i == 0 and zeroed inside the kernel.
            pl.BlockSpec((1, hb, c_in_p),
                         lambda b, i: (b, jnp.maximum(i * ratio - 1, 0), 0)),
            # current time block
            pl.BlockSpec((1, tb, c_in_p), lambda b, i: (b, i, 0)),
            # fused tap weights, resident across the grid
            pl.BlockSpec((k * c_in_p, c_out_p), lambda b, i: (0, 0)),
        ],
        out_specs=pl.BlockSpec((1, tb, c_out_p), lambda b, i: (b, i, 0)),
        compiler_params=pltpu.CompilerParams(
            dimension_semantics=("parallel", "parallel"),
            vmem_limit_bytes=vmem_limit),
    )(x_pad, x_pad, w_flat)

    return out[:, :t, :c_out].transpose(0, 2, 1)                    # (N, C_out, T)


def _reference(x_nct, w_oik, dilation):
    """Pure-JAX (f32) reference matching the PyTorch DilatedConvBlock forward."""
    n, c_in, t = x_nct.shape
    c_out, _, k = w_oik.shape
    pad = (k - 1) * dilation
    xp = jnp.pad(x_nct, ((0, 0), (0, 0), (pad, 0)))
    y = jnp.zeros((n, c_out, t), jnp.float32)
    for j in range(k):
        y = y + jnp.einsum('nct,oc->not',
                           xp[:, :, j * dilation: j * dilation + t],
                           w_oik[:, :, j])
    return y.astype(x_nct.dtype)


if __name__ == "__main__":
    key = jax.random.PRNGKey(0)

    # config 1: multiple time blocks, small dilation (misaligned taps), bf16 MXU
    N, C_IN, C_OUT, T, K, D = 2, 16, 32, 48, 2, 4
    k1, k2, key = jax.random.split(key, 3)
    x1 = jax.random.normal(k1, (N, C_IN, T), jnp.float32)
    w1 = 0.1 * jax.random.normal(k2, (C_OUT, C_IN, K), jnp.float32)
    y1 = dilated_conv_block(x1, w1, D, target_block_rows=16)
    jax.block_until_ready(y1)
    y1_ref = _reference(x1, w1, D)
    assert y1.shape == (N, C_OUT, T)
    assert jnp.allclose(y1, y1_ref, rtol=2e-2, atol=2e-2), \
        float(jnp.max(jnp.abs(y1 - y1_ref)))

    # same config on the f32 MXU path: must match the reference tightly
    y1f = dilated_conv_block(x1, w1, D, target_block_rows=16,
                             matmul_dtype=jnp.float32)
    jax.block_until_ready(y1f)
    assert jnp.allclose(y1f, y1_ref, rtol=1e-5, atol=1e-5)

    # config 2: K=3, dilation a sublane multiple, single time block per sequence
    N2, C_IN2, C_OUT2, T2, K2, D2 = 2, 16, 16, 48, 3, 8
    k3, k4, key = jax.random.split(key, 3)
    x2 = jax.random.normal(k3, (N2, C_IN2, T2), jnp.float32)
    w2 = 0.1 * jax.random.normal(k4, (C_OUT2, C_IN2, K2), jnp.float32)
    y2 = dilated_conv_block(x2, w2, D2)
    jax.block_until_ready(y2)
    y2_ref = _reference(x2, w2, D2)
    assert y2.shape == (N2, C_OUT2, T2)
    assert jnp.allclose(y2, y2_ref, rtol=2e-2, atol=2e-2)

    print("KERNEL_OK")
</pallas_src>

<mosaic_0001>
module attributes {stable_mosaic.version = 11 : i64} {
  func.func @_causal_dilated_conv_kernel(%arg0: i32, %arg1: i32, %arg2: memref<1x16x128xf32, #tpu.memory_space<vmem>>, %arg3: memref<1x16x128xf32, #tpu.memory_space<vmem>>, %arg4: memref<256x128xbf16, #tpu.memory_space<vmem>>, %arg5: memref<1x16x128xf32, #tpu.memory_space<vmem>>) attributes {dimension_semantics = [#tpu.dimension_semantics<parallel>, #tpu.dimension_semantics<parallel>], iteration_bounds = array<i64: 2, 3>, scalar_prefetch = 0 : i64, scratch_operands = 0 : i64, tpu.core_type = #tpu.core_type<tc>, window_params = [{transform_indices = @transform_0, window_bounds = array<i64: 1, 16, 128>}, {transform_indices = @transform_1, window_bounds = array<i64: 1, 16, 128>}, {pipeline_mode = #tpu.pipeline_mode<synchronous>, transform_indices = @transform_2, window_bounds = array<i64: 256, 128>}, {transform_indices = @transform_3, window_bounds = array<i64: 1, 16, 128>}]} {
    %c0 = arith.constant 0 : index
    %c0_0 = arith.constant 0 : index
    %c0_1 = arith.constant 0 : index
    %0 = vector.load %arg2[%c0, %c0_0, %c0_1] : memref<1x16x128xf32, #tpu.memory_space<vmem>>, vector<1x16x128xf32>
    %1 = vector.shape_cast %0 : vector<1x16x128xf32> to vector<16x128xf32>
    %2 = arith.truncf %1 : vector<16x128xf32> to vector<16x128xbf16>
    %c0_2 = arith.constant 0 : index
    %c0_3 = arith.constant 0 : index
    %c0_4 = arith.constant 0 : index
    %3 = vector.load %arg3[%c0_2, %c0_3, %c0_4] : memref<1x16x128xf32, #tpu.memory_space<vmem>>, vector<1x16x128xf32>
    %4 = vector.shape_cast %3 : vector<1x16x128xf32> to vector<16x128xf32>
    %5 = arith.truncf %4 : vector<16x128xf32> to vector<16x128xbf16>
    %c0_i32 = arith.constant 0 : i32
    %6 = arith.cmpi sgt, %arg1, %c0_i32 : i32
    %7 = arith.extui %6 : i1 to i32
    %8 = arith.sitofp %7 : i32 to f32
    %9 = arith.truncf %8 : f32 to bf16
    %10 = vector.broadcast %9 : bf16 to vector<16x128xbf16>
    %11 = arith.mulf %2, %10 : vector<16x128xbf16>
    %12 = vector.extract_strided_slice %11 {offsets = [12, 0], sizes = [4, 128], strides = [1, 1]} : vector<16x128xbf16> to vector<4x128xbf16>
    %13 = vector.extract_strided_slice %5 {offsets = [0, 0], sizes = [12, 128], strides = [1, 1]} : vector<16x128xbf16> to vector<12x128xbf16>
    %14 = tpu.concatenate %12, %13 in 0 : vector<4x128xbf16>, vector<12x128xbf16> -> vector<16x128xbf16>
    %15 = tpu.concatenate %14, %5 in 1 : vector<16x128xbf16>, vector<16x128xbf16> -> vector<16x256xbf16>
    %c0_5 = arith.constant 0 : index
    %c0_6 = arith.constant 0 : index
    %16 = vector.load %arg4[%c0_5, %c0_6] : memref<256x128xbf16, #tpu.memory_space<vmem>>, vector<256x128xbf16>
    %cst = arith.constant dense<0.000000e+00> : vector<16x128xf32>
    %17 = tpu.matmul %15, %16, %cst {dimension_numbers = #tpu.dot_dimension_numbers<[1], [0], [0], [1], [0, 0, 1, 1], [], []>} : vector<16x256xbf16>, vector<256x128xbf16>, vector<16x128xf32> -> vector<16x128xf32>
    %c0_7 = arith.constant 0 : index
    %c0_8 = arith.constant 0 : index
    %c0_9 = arith.constant 0 : index
    %18 = vector.load %arg5[%c0_7, %c0_8, %c0_9] : memref<1x16x128xf32, #tpu.memory_space<vmem>>, vector<1x16x128xf32>
    %19 = vector.shape_cast %18 : vector<1x16x128xf32> to vector<16x128xf32>
    %20 = vector.shape_cast %17 : vector<16x128xf32> to vector<1x16x128xf32>
    tpu.vector_store %arg5[%c0_7, %c0_8, %c0_9], %20 {strides = array<i32>} : memref<1x16x128xf32, #tpu.memory_space<vmem>>, vector<1x16x128xf32>,
    return
  }
  func.func @transform_0(%arg0: i32, %arg1: i32) -> (i32, i32, i32) {
    %c1_i32 = arith.constant 1 : i32
    %0 = arith.muli %arg1, %c1_i32 : i32
    %c1_i32_0 = arith.constant 1 : i32
    %1 = arith.subi %0, %c1_i32_0 : i32
    %c0_i32 = arith.constant 0 : i32
    %2 = arith.maxsi %1, %c0_i32 : i32
    %c0_i32_1 = arith.constant 0 : i32
    %c0_i32_2 = arith.constant 0 : i32
    return %arg0, %2, %c0_i32_1 : i32, i32, i32
  }
  func.func @transform_1(%arg0: i32, %arg1: i32) -> (i32, i32, i32) {
    %c0_i32 = arith.constant 0 : i32
    %c0_i32_0 = arith.constant 0 : i32
    return %arg0, %arg1, %c0_i32 : i32, i32, i32
  }
  func.func @transform_2(%arg0: i32, %arg1: i32) -> (i32, i32) {
    %c0_i32 = arith.constant 0 : i32
    %c0_i32_0 = arith.constant 0 : i32
    %c0_i32_1 = arith.constant 0 : i32
    return %c0_i32, %c0_i32_0 : i32, i32
  }
  func.func @transform_3(%arg0: i32, %arg1: i32) -> (i32, i32, i32) {
    %c0_i32 = arith.constant 0 : i32
    %c0_i32_0 = arith.constant 0 : i32
    return %arg0, %arg1, %c0_i32 : i32, i32, i32
  }
}

</mosaic_0001>

<bundles_post_ra>
// kernel: tpu_custom_call.1
= control target key start
LH: loop header
LB: loop body
LE: loop exit
PB: predicated region body
PF: predicated region fallthrough
CT: control target
= control target key end

     0   :  { %s1435_s0 = inlined_call_operand.hbm [shape: f32[2,48,128], index: 0, kind: input, shape index: {}]   ;;  %s1436_s1 = inlined_call_operand.hbm [shape: f32[2,48,128], index: 1, kind: input, shape index: {}]   ;;  %s1437_s2 = inlined_call_operand.hbm [shape: bf16[256,128], index: 2, kind: input, shape index: {}]   ;;  %s1438_s3 = inlined_call_operand.hbm [shape: f32[2,48,128], index: 3, kind: output, shape index: {}]  }
   0x1   :  { %1451 = sst [smem:[#allocation17_spill]] %s1435_s0 }
   0x2   :  { %1452 = sst [smem:[#allocation18_spill]] %s1437_s2 }
   0x3   :  { %8 = vsyncpa [#allocation3], 0 }
   0x4   :  { %10 = vsyncpa [#allocation3 + $0x1], 0 }
   0x5   :  { %11 = vsyncpa [#allocation6], 0 }
   0x6   :  { %13 = vsyncpa [#allocation6 + $0x1], 0 }
   0x7   :  { %14 = vsyncpa [#allocation4], 0 }
   0x8   :  { %16 = vsyncpa [#allocation4 + $0x1], 0  ;;  %s1081_s12 = smov 0   ;;  %s1083_s13 = smov 0  }
   0x9   :  { %s1085_s14 = smov 0   ;;  %s1087_s15 = smov 0  }
   0xa   :  { %s1089_s16 = smov 0   ;;  %s1091_s17 = smov 0  }
   0xb   :  { %s1093_s18 = smov 0   ;;  %s1095_s19 = smov 0  }
   0xc   :  { %s1097_s20 = smov 0   ;;  %s1099_s21 = smov 0  }
   0xd   :  { %s1101_s22 = smov 0  }
   0xe LB: > { %1453 = sst [smem:[#allocation13_spill]] %s1009_s12  ;;  %s1135_s23 = sadd.s32 4294967295, %s1049_s22   ;;  %s1049_s22 = sphi %s1101_s22, %s22_s22   ;;  %s1045_s21 = sphi %s1099_s21, %s1491_s21   ;;  %s1041_s20 = sphi %s1097_s20, %s1490_s20   ;;  %s1037_s19 = sphi %s1095_s19, %s1489_s19   ;;  %s1033_s18 = sphi %s1093_s18, %s1488_s18   ;;  %s1029_s17 = sphi %s1091_s17, %s1487_s17   ;;  %s1025_s16 = sphi %s1089_s16, %s1486_s16   ;;  %s1021_s15 = sphi %s1087_s15, %s1485_s15   ;;  %s1017_s14 = sphi %s1085_s14, %s1484_s14   ;;  %s1013_s13 = sphi %s1083_s13, %s1483_s13   ;;  %s1009_s12 = sphi %s1081_s12, %s1482_s12  }
   0xf   : > { %s627_s24 = sadd.s32 4294967294, %s1049_s22   ;;  %p62_p0 = scmp.ne.s32.totalorder %s1025_s16, %s1021_s15 }
  0x10   : > { %p1439_p1 = scmp.eq.s32.totalorder %s1135_s23, 0  ;;  %p90_p2 = scmp.ne.s32.totalorder %s1013_s13, %s1009_s12 }
  0x11   : > { %p143_p5 = scmp.eq.s32.totalorder %s627_s24, 5  ;;  %p630_p7 = scmp.ge.s32.totalorder %s1049_s22, 1 }
  0x12   : > { %p1145_p4 = por %p1439_p1, %p62_p0  ;;  %p1151_p6 = por %p90_p2, %p1439_p1 }
  0x13   : > { %p1156_p8 = por %p143_p5, %p90_p2  ;;  %p150_p9 = scmp.lt.s32.totalorder %s1049_s22, 7 }
  0x14   : > { %s1454_s25 = scalar_select %p1145_p4, 1, 0 }
  0x15   : > { %s1455_s26 = scalar_select %p1151_p6, 1, 0 }
  0x16   : > { %s1456_s27 = scalar_select %p1156_p8, 1, 0 }
  0x17   : > { %p1161_p10 = pnand %p630_p7, %p150_p9  ;;  %s1051_s29 = smov [#allocation7]  }
  0x18   : > { %1457 = sst [smem:[#allocation14_spill]] %s1456_s27  ;;  %s162_s30 = sshll.u32 %s1051_s29, 4  ;;  %s163_s30 = int_to_ptr.vmem [resolvable:$true] %s162_s30 }
  0x19   : > { %s1458_s28 = scalar_select %p1161_p10, 1, 0 }
  0x1a   : > { %p701_p11 = pneg %p1161_p10  ;;  %s1460_s2 = sld [smem:[#allocation18_spill]] }
  0x1c   : > { %p1169_p12 = pnand %p701_p11, %p1439_p1 }
  0x1e   : > { %p833_p0 = pneg %p1169_p12 }
  0x20   : > { %s831_s7 = scalar_lea.hbm %s1460_s2, 2048 }
  0x21   : > { %p832_p13 = scmp.ne.s32.totalorder %s1460_s2, %s831_s7  ;;  %p838_p7 = scmp.lt.u32.totalorder %s831_s7, %s1460_s2 }
  0x23   : > { %p834_p2 = pnand %p833_p0, %p832_p13 }
  0x25   : > { %p835_p5 = pneg %p834_p2 }
  0x27   : > { %p840_p9 = pnand %p838_p7, %p835_p5 }
  0x29   : > { %843 = shalt.err (!%p840_p9)
}
  0x2a   : > { %s844_s15 = scalar_lea.vmem %s163_s30, 2048  ;;  %p852_p8 = scmp.lt.s32.totalorder %s163_s30, %s163_s30 }
  0x2b   : > { %p845_p11 = scmp.ne.s32.totalorder %s163_s30, %s844_s15  ;;  %p853_p6 = scmp.lt.s32.totalorder %s844_s15, %s844_s15 }
  0x2d   : > { %p847_p1 = pnand %p845_p11, %p833_p0  ;;  %p854_p4 = por %p853_p6, %p852_p8 }
  0x2f   : > { %p848_p3 = pneg %p847_p1 }
  0x31   : > { %p855_p10 = pnand %p854_p4, %p848_p3 }
  0x33   : > { %858 = shalt.err (!%p855_p10)
}
  0x34   : > { %s1052_s24 = smov 64   ;;  %s1053_s29 = smov 4  }
  0x35   : > { %704 = dma.hbm_to_vmem [thread:$0]  (!%p1169_p12), %s1460_s2, 2048, %s163_s30, [#allocation6], %s1052_s24, %s1052_s24, %s1053_s29  }
  0x36   : > { %s31_s7 = sadd.s32 1, %s1041_s20  ;;  %s34_s8 = sadd.s32 1, %s1045_s21 }
  0x37   : > { %p32_p1 = scmp.ge.s32.totalorder %s31_s7, 3  ;;  %s628_s9 = sadd.s32 4294967295, %s1041_s20 }
  0x38   : > { %s49_s10 = sadd.s32 1, %s1029_s17  ;;  %p39_p3 = scmp.gt.s32.totalorder %s628_s9, 0 }
  0x39   : > { %s1493_s7 = smov (%p32_p1, %s31_s7), 0  ;;  %s1495_s8 = smov (!%p32_p1, %s34_s8), %s1045_s21 }
  0x3a   : > { %1461 = sst [smem:[#allocation15_spill]] %s1493_s7  ;;  %s629_s4 = sadd.s32 4294967295, %s1493_s7 }
  0x3b   : > { %p36_p4 = scmp.ge.s32.totalorder %s1495_s8, 2  ;;  %p42_p6 = scmp.gt.s32.totalorder %s629_s4, 0 }
  0x3c   : > { %s1497_s9 = smov (!%p39_p3, %s628_s9), 0  ;;  %p56_p8 = scmp.ne.s32.totalorder %s1029_s17, %s1025_s16 }
  0x3d   : > { %s1499_s8 = smov (%p36_p4, %s1495_s8), 0  ;;  %s1501_s4 = smov (!%p42_p6, %s629_s4), 0 }
  0x3e   : > { %1462 = sst [smem:[#allocation16_spill]] %s1499_s8  ;;  %s44_s30 = ssub.s32 %s1045_s21, %s1499_s8 }
  0x3f   : > { %s45_s11 = ssub.s32 %s1497_s9, %s1501_s4  ;;  %p1448_p10 = scmp.eq.s32.totalorder %s1049_s22, 0 }
  0x40   : > { %s46_s15 = sor.u32 %s45_s11, %s44_s30  ;;  %s73_s24 = ssub.s32 %s1041_s20, %s1493_s7 }
  0x41   : > { %p47_p12 = scmp.eq.s32.totalorder %s46_s15, 0  ;;  %p58_p13 = por %p1448_p10, %p56_p8 }
  0x42   : > { %s1208_s29 = sor.u32 %s73_s24, %s44_s30  ;;  %p1447_p0 = scmp.lt.s32.totalorder %s1049_s22, 6 }
  0x43   : > { %s1212_s5 = scalar_select %p47_p12, %s1029_s17, %s49_s10  }
  0x44   : > { %p75_p2 = scmp.eq.s32.totalorder %s1208_s29, 0  ;;  %s176_s6 = sand.u32 1, %s1029_s17  }
  0x45   : > { %s633_s2 = sshll.u32 %s176_s6, 4  ;;  %s635_s8 = sshll.u32 %s1497_s9, 1 }
  0x46   : > { %s688_s27 = smul.u32 6, %s1045_s21  ;;  %s180_s4 = scalar_lea.vmem [#allocation2], %s633_s2 }
  0x47   : > { %s192_s12 = sshll.u32 %s180_s4, 4  ;;  %p1221_p5 = pnand %p1447_p0, %p58_p13  ;;  %s1217_s12 = int_to_ptr.vmem [resolvable:$true] %s192_s12 }
  0x48   : > { %s189_s30 = sadd.s32 %s688_s27, %s635_s8  ;;  %s1464_s0 = sld [smem:[#allocation17_spill]] }
  0x49   : > { %s636_s10 = sshll.u32 %s189_s30, 7  ;;  %s1232_s2 = scalar_lea.sflag [#allocation3], %s176_s6 }
  0x4a   : > { %p861_p9 = pneg %p1221_p5 }
  0x4e   : > { %s1230_s7 = scalar_lea.hbm %s1464_s0, %s636_s10  ;;  %s864_s30 = scalar_lea.hbm %s1464_s0, 1536 }
  0x4f   : > { %s859_s9 = scalar_lea.hbm %s1230_s7, 256  ;;  %p865_p3 = scmp.lt.u32.totalorder %s1230_s7, %s1464_s0 }
  0x50   : > { %p860_p7 = scmp.ne.s32.totalorder %s1230_s7, %s859_s9  ;;  %p866_p4 = scmp.lt.u32.totalorder %s864_s30, %s859_s9 }
  0x51   : > { %p868_p8 = scmp.lt.u32.totalorder %s859_s9, %s1230_s7 }
  0x52   : > { %p862_p11 = pnand %p861_p9, %p860_p7  ;;  %p867_p6 = por %p866_p4, %p865_p3 }
  0x54   : > { %p863_p1 = pneg %p862_p11  ;;  %p869_p12 = por %p868_p8, %p867_p6 }
  0x56   : > { %p870_p13 = pnand %p869_p12, %p863_p1 }
  0x58   : > { %873 = shalt.err (!%p870_p13)
}
  0x59   : > { %s874_s6 = scalar_lea.vmem %s1217_s12, 256  ;;  %s1054_s24 = smov [#allocation2]  }
  0x5a   : > { %p875_p7 = scmp.ne.s32.totalorder %s1217_s12, %s874_s6  ;;  %s879_s8 = sshll.u32 %s1054_s24, 4  ;;  %s880_s8 = int_to_ptr.vmem [resolvable:$false] %s879_s8 }
  0x5b   : > { %s881_s4 = scalar_lea.vmem %s880_s8, 512  ;;  %p882_p10 = scmp.lt.s32.totalorder %s1217_s12, %s880_s8 }
  0x5c   : > { %p877_p11 = pnand %p875_p7, %p861_p9  ;;  %p883_p3 = scmp.lt.s32.totalorder %s881_s4, %s874_s6 }
  0x5e   : > { %p878_p0 = pneg %p877_p11  ;;  %p884_p4 = por %p883_p3, %p882_p10 }
  0x60   : > { %p885_p6 = pnand %p884_p4, %p878_p0 }
  0x62   : > { %888 = shalt.err (!%p885_p6)
}
  0x63   : > { %s1449_s9 = smov 128   ;;  %s1450_s30 = smov 8  }
  0x64   : > { %708 = dma.hbm_to_vmem [thread:$0]  (!%p1221_p5), %s1230_s7, 256, %s1217_s12, %s1232_s2, %s1449_s9, %s1449_s9, %s1450_s30  }
  0x65   : > { %s202_s10 = sand.u32 1, %s1049_s22   ;;  %s77_s15 = sadd.s32 1, %s1017_s14 }
  0x66   : > { %p84_p10 = scmp.ne.s32.totalorder %s1017_s14, %s1013_s13  ;;  %p1465_p0 = scmp.eq.s32.totalorder %s1049_s22, 0 }
  0x67   : > { %s1270_s6 = scalar_select %p75_p2, %s1017_s14, %s77_s15  }
  0x68   : > { %p86_p9 = por %p84_p10, %p1465_p0  ;;  %p1466_p1 = scmp.eq.s32.totalorder %s1135_s23, 5 }
  0x69   : > { %s204_s8 = sand.u32 1, %s1017_s14   ;;  %s638_s11 = sshll.u32 %s1041_s20, 1 }
  0x6a   : > { %p1276_p8 = por %p1466_p1, %p84_p10  ;;  %s637_s4 = sshll.u32 %s204_s8, 4 }
  0x6b   : > { %s212_s0 = sadd.s32 %s688_s27, %s638_s11  ;;  %s206_s29 = scalar_lea.vmem [#allocation5], %s637_s4 }
  0x6c   : > { %s639_s12 = sshll.u32 %s212_s0, 7  ;;  %s215_s15 = sshll.u32 %s206_s29, 4  ;;  %s1289_s15 = int_to_ptr.vmem [resolvable:$true] %s215_s15 }
  0x6d   : > { %s1287_s9 = scalar_lea.hbm %s1436_s1, %s639_s12  ;;  %p1468_p2 = scmp.lt.s32.totalorder %s1049_s22, 6 }
  0x6e   : > { %s1297_s0 = scalar_lea.sflag [#allocation6], %s202_s10  ;;  %s889_s27 = scalar_lea.hbm %s1287_s9, 256 }
  0x6f   : > { %p1293_p5 = pnand %p1468_p2, %p86_p9  ;;  %p890_p12 = scmp.ne.s32.totalorder %s1287_s9, %s889_s27 }
  0x70   : > { %s894_s4 = scalar_lea.hbm %s1436_s1, 1536  ;;  %p895_p3 = scmp.lt.u32.totalorder %s1287_s9, %s1436_s1 }
  0x71   : > { %p891_p13 = pneg %p1293_p5  ;;  %p896_p4 = scmp.lt.u32.totalorder %s894_s4, %s889_s27 }
  0x72   : > { %p898_p10 = scmp.lt.u32.totalorder %s889_s27, %s1287_s9 }
  0x73   : > { %p892_p7 = pnand %p891_p13, %p890_p12  ;;  %p897_p6 = por %p896_p4, %p895_p3 }
  0x75   : > { %p893_p11 = pneg %p892_p7  ;;  %p899_p0 = por %p898_p10, %p897_p6 }
  0x77   : > { %p900_p9 = pnand %p899_p0, %p893_p11 }
  0x79   : > { %903 = shalt.err (!%p900_p9)
}
  0x7a   : > { %s904_s10 = scalar_lea.vmem %s1289_s15, 256  ;;  %s1057_s2 = smov [#allocation5]  }
  0x7b   : > { %p905_p1 = scmp.ne.s32.totalorder %s1289_s15, %s904_s10  ;;  %s909_s29 = sshll.u32 %s1057_s2, 4  ;;  %s910_s29 = int_to_ptr.vmem [resolvable:$false] %s909_s29 }
  0x7c   : > { %s911_s8 = scalar_lea.vmem %s910_s29, 512  ;;  %p912_p7 = scmp.lt.s32.totalorder %s1289_s15, %s910_s29 }
  0x7d   : > { %p907_p2 = pnand %p905_p1, %p891_p13  ;;  %p913_p3 = scmp.lt.s32.totalorder %s911_s8, %s904_s10 }
  0x7f   : > { %p908_p12 = pneg %p907_p2  ;;  %p914_p4 = por %p913_p3, %p912_p7 }
  0x81   : > { %p915_p6 = pnand %p914_p4, %p908_p12 }
  0x83   : > { %918 = shalt.err (!%p915_p6)
}
  0x84   : > { %s1470_s27 = smov 8   ;;  %s1471_s11 = smov 128  }
  0x85   : > { %711 = dma.hbm_to_vmem [thread:$0]  (!%p1293_p5), %s1287_s9, 256, %s1289_s15, %s1297_s0, %s1471_s11, %s1471_s11, %s1470_s27  }
  0x86   : > { %p1472_p13 = scmp.ne.s32.totalorder %s1458_s28, 0 }
  0x87   : > { %s229_s4 = sand.u32 (!%p1472_p13), 1, %s1025_s16   ;;  %p1473_p11 = scmp.ne.s32.totalorder (!%p1472_p13), %s1454_s25, 0 }
  0x88   : > { %227 = sbr.rel (%p1472_p13) target bundleno = 417 (0x1a1), region = 32  ;;  %s1331_s12 = sshll.u32 (!%p1472_p13), %s229_s4, 4 }
  0x89   : > { %s230_s7 = scalar_lea.sflag (!%p1472_p13), [#allocation3], %s229_s4  ;;  %s233_s10 = scalar_lea.vmem (!%p1472_p13), [#allocation2], %s1331_s12 }
  0x8f   : > { %992 = dma.done.wait (%p1473_p11), %s230_s7, 256  }
  0x90   : > { %994 = vsyncadd (%p1473_p11), %s230_s7, 4294967040  ;;  %s238_s9 = sand.u32 1, %s1135_s23   ;;  %s240_s28 = sand.u32 1, %s1013_s13  }
  0x91   : > { %s1342_s30 = sshll.u32 %s240_s28, 4  ;;  %s239_s15 = scalar_lea.sflag [#allocation6], %s238_s9 }
  0x92   : > { %s242_s0 = scalar_lea.vmem [#allocation5], %s1342_s30  ;;  %p1474_p5 = scmp.ne.s32.totalorder %s1455_s26, 0 }
  0x94   : > { %996 = dma.done.wait (%p1474_p5), %s239_s15, 256  }
  0x95   : > { %998 = vsyncadd (%p1474_p5), %s239_s15, 4294967040  ;;  %p1475_p10 = scmp.eq.s32.totalorder %s1135_s23, 0 }
  0x97   : > { %1000 = dma.done.wait (%p1475_p10), [#allocation6], 2048   ;;  %p1476_p0 = pmov %p1475_p10 }
  0x98   : > { %p287_p9 = scmp.gt.s32.totalorder %s1033_s18, 0  ;;  %v815_v0 = vld [vmem:[#allocation7 + $0x40] sm:$0xff]   ;;  %v817_v2 = vld [vmem:[#allocation7 + $0x48] sm:$0xff]   ;;  %v819_v4 = vld [vmem:[#allocation7 + $0x50] sm:$0xff]   ;;  %vm309_vm0 = vcmask 1041408   ;;  %s690_s12 = smul.u32 6, %s1037_s19 }
  0x99   : > { %1002 = vsyncadd (%p1476_p0), [#allocation6], 4294965248  ;;  %v816_v1 = vld [vmem:[#allocation7] sm:$0xff]   ;;  %666 = vmatprep.subr.bf16.mxu0 %v815_v0  ;;  %v818_v3 = vld [vmem:[#allocation7 + $0x8] sm:$0xff]   ;;  %s273_s15 = scalar_lea.vmem [#allocation8], %s1342_s30 }
  0x9a   : > { %s288_s25 = scalar_select %p287_p9, 1, 0  ;;  %667 = vmatpush3.bf16.msra.mxu0 %v816_v1  ;;  %v820_v5 = vld [vmem:[#allocation7 + $0x10] sm:$0xff]   ;;  %v821_v6 = vld [vmem:[#allocation7 + $0x58] sm:$0xff]   ;;  %v823_v8 = vld [vmem:[#allocation7 + $0x60] sm:$0xff]  }
  0x9b   : > { %668 = vmatprep.subr.bf16.mxu0 %v817_v2  ;;  %v822_v7 = vld [vmem:[#allocation7 + $0x18] sm:$0xff]   ;;  %v824_v9 = vld [vmem:[#allocation7 + $0x20] sm:$0xff]   ;;  %v825_v10 = vld [vmem:[#allocation7 + $0x68] sm:$0xff]  }
  0x9c   : > { %s289_s2 = scvt.s32.f32 %s288_s25  ;;  %v284_v11 = vld [vmem:[%s242_s0] sm:$0xff]  ;;  %v285_v12 = vld [vmem:[%s242_s0 + $0x8] sm:$0xff]  ;;  %s501_s0 = sshll.u32 %s273_s15, 4  ;;  %s1365_s0 = int_to_ptr.vmem [resolvable:$true] %s501_s0 }
  0x9d   : > { %v281_v13 = vld [vmem:[%s233_s10] sm:$0xff]  ;;  %v286_v14 = vpack.c.bf16 %v285_v12, %v284_v11  ;;  %v282_v15 = vld [vmem:[%s233_s10 + $0x8] sm:$0xff]  ;;  %s662_s10 = sshll.u32 %s1033_s18, 1  ;;  %s1374_s18 = scalar_lea.sflag [#allocation4], %s240_s28 }
  0x9e   : > { %s292_s29 = sshrl.u32 %s289_s2, 16  ;;  %p291_p1 = scmp.ne.f32.partialorder %s289_s2, %s289_s2  ;;  %669 = vmatpush3.bf16.msra.mxu0 %v818_v3  ;;  %v826_v16 = vld [vmem:[#allocation7 + $0x28] sm:$0xff]   ;;  %v283_v17 = vpack.c.bf16 %v282_v15, %v281_v13  ;;  %v827_v18 = vld [vmem:[#allocation7 + $0x70] sm:$0xff]   ;;  %v829_v22 = vld [vmem:[#allocation7 + $0x78] sm:$0xff]  }
  0x9f   : > { %s293_s8 = sand.u32 1, %s292_s29  ;;  %670 = vmatprep.subr.bf16.mxu0 %v819_v4  ;;  %474 = vmatprep.mubr.bf16.mxu0 %v286_v14  ;;  %v828_v20 = vld [vmem:[#allocation7 + $0x30] sm:$0xff]   ;;  %v830_v23 = vld [vmem:[#allocation7 + $0x38] sm:$0xff]   ;;  %v308_v24 = vrot.slane %v286_v14, 6  ;;  %s498_s9 = sadd.s32 %s690_s12, %s662_s10 }
  0xa0   : > { %s294_s27 = sadd.s32 32767, %s293_s8  ;;  %s663_s25 = sshll.u32 %s498_s9, 7 }
  0xa1   : > { %s295_s11 = sadd.s32 %s294_s27, %s289_s2  ;;  %s1370_s19 = scalar_lea.hbm %s1438_s3, %s663_s25 }
  0xa2   : > { %s296_s26 = sand.u32 4294901760, %s295_s11  ;;  %671 = vmatpush3.bf16.msra.mxu0 %v820_v5  ;;  %s919_s30 = scalar_lea.vmem %s1365_s0, 256 }
  0xa3   : > { %s1503_s26 = smov (%p291_p1, %s296_s26), 2143289344  ;;  %672 = vmatprep.subr.bf16.mxu0 %v821_v6  ;;  %p920_p2 = scmp.ne.s32.totalorder %s1365_s0, %s919_s30 }
  0xa4   : > { %s299_s23 = sshrl.u32 %s1503_s26, 16  ;;  %s1058_s8 = smov [#allocation8]  }
  0xa5   : > { %s300_s4 = sshll.u32 %s299_s23, 16  ;;  %p921_p12 = pnand %p920_p2, %p1276_p8 }
  0xa6   : > { %673 = vmatpush3.bf16.msra.mxu0 %v822_v7  ;;  %s301_s7 = sor.u32 %s300_s4, %s299_s23  ;;  %s923_s27 = sshll.u32 %s1058_s8, 4  ;;  %s924_s27 = int_to_ptr.vmem [resolvable:$false] %s923_s27 }
  0xa7   : > { %674 = vmatprep.subr.bf16.mxu0 %v823_v8  ;;  %v302_v19 = vstv %s301_s7  ;;  %p922_p7 = pneg %p921_p12  ;;  %s925_s11 = scalar_lea.vmem %s924_s27, 512 }
  0xa8   : > { %v304_v21 = vmul.bf16 %v302_v19, %v283_v17  ;;  %p926_p3 = scmp.lt.s32.totalorder %s1365_s0, %s924_s27  ;;  %p927_p4 = scmp.lt.s32.totalorder %s925_s11, %s919_s30 }
  0xaa   : > { %675 = vmatpush3.bf16.msra.mxu0 %v824_v9  ;;  %v306_v25 = vrot.slane %v304_v21, 6  ;;  %p928_p6 = por %p927_p4, %p926_p3 }
  0xab   : > { %676 = vmatprep.subr.bf16.mxu0 %v825_v10 }
  0xac   : > { %v312_v26 = vsel %vm309_vm0, %v306_v25, %v308_v24  ;;  %p929_p13 = pnand %p928_p6, %p922_p7 }
  0xae   : > { %677 = vmatpush3.bf16.msra.mxu0 %v826_v16 }
  0xaf   : > { %678 = vmatprep.subr.bf16.mxu0 %v827_v18 }
  0xb2   : > { %679 = vmatpush3.bf16.msra.mxu0 %v828_v20 }
  0xb3   : > { %680 = vmatprep.subr.bf16.mxu0 %v829_v22 }
  0xb6   : > { %681 = vmatpush3.bf16.msra.mxu0 %v830_v23 }
  0xb9   : > { %475 = vmatmul.mubr.bf16.vlgmr.msra.gmra.mrb[0].mxu0 %v312_v26 }
 0x18c   : > { %v682_v27 = vpop.f32.mrb[0].mxu0 }
 0x18d   : > { %v683_v28 = vpop.f32.mrb[1].mxu0 }
 0x18e   : > { %v684_v29 = vadd.f32 %v683_v28, %v682_v27  ;;  %v685_v30 = vpop.f32.mrb[2].mxu0 }
 0x18f   : > { %v686_v31 = vpop.f32.mrb[3].mxu0 }
 0x190   : > { %483 = vst [vmem:[%s273_s15] sm:$0xff] %v684_v29  ;;  %v687_v32 = vadd.f32 %v686_v31, %v685_v30 }
 0x192   : > { %484 = vst [vmem:[%s273_s15 + $0x8] sm:$0xff] %v687_v32 }
 0x193   : > { %932 = shalt.err (!%p929_p13)
}
 0x194   : > { %s933_s28 = scalar_lea.hbm %s1370_s19, 256  ;;  %s937_s4 = scalar_lea.hbm %s1438_s3, 1536 }
 0x195   : > { %p934_p11 = scmp.ne.s32.totalorder %s1370_s19, %s933_s28  ;;  %p938_p0 = scmp.lt.u32.totalorder %s1370_s19, %s1438_s3 }
 0x196   : > { %p939_p9 = scmp.lt.u32.totalorder %s937_s4, %s933_s28  ;;  %p941_p2 = scmp.lt.u32.totalorder %s933_s28, %s1370_s19 }
 0x197   : > { %p935_p5 = pnand %p934_p11, %p1276_p8 }
 0x198   : > { %p940_p1 = por %p939_p9, %p938_p0 }
 0x199   : > { %p936_p10 = pneg %p935_p5 }
 0x19a   : > { %p942_p12 = por %p941_p2, %p940_p1 }
 0x19c   : > { %p943_p7 = pnand %p942_p12, %p936_p10 }
 0x19e   : > { %946 = shalt.err (!%p943_p7)
}
 0x19f   : > { %s1059_s10 = smov 128   ;;  %s1060_s9 = smov 8  }
 0x1a0   : > { %699 = dma.vmem_to_hbm [thread:$0]  (%p1276_p8), %s1365_s0, 256, %s1370_s19, %s1374_s18, %s1059_s10, %s1059_s10, %s1060_s9  }
 0x1a1 PF: > { %s1477_s15 = sld [smem:[#allocation13_spill]]  ;;  %s1478_s25 = sld [smem:[#allocation14_spill]] }
 0x1a2   : > { %p719_p3 = scmp.ge.s32.totalorder %s1049_s22, 2 }
 0x1a7   : > { %s516_s2 = sand.u32 1, %s1477_s15   ;;  %p1479_p4 = scmp.ne.s32.totalorder %s1478_s25, 0 }
 0x1a8   : > { %s517_s29 = scalar_lea.sflag [#allocation4], %s516_s2 }
 0x1a9   : > { %p713_p6 = pnand %p719_p3, %p1479_p4 }
 0x1ab   : > { %1004 = dma.done.wait (!%p713_p6), %s517_s29, 256  }
 0x1ac   : > { %1006 = vsyncadd (!%p713_p6), %s517_s29, 4294967040  ;;  %s22_s22 = sadd.s32 1, %s1049_s22   ;;  %s1480_s24 = sld [smem:[#allocation15_spill]] }
 0x1ad   : > { %p19_p13 = scmp.ge.s32.totalorder %s22_s22, 8   ;;  %s1481_s0 = sld [smem:[#allocation16_spill]] }
 0x1ae   : > { %s1482_s12 = smov %s1013_s13  ;;  %s1483_s13 = smov %s1017_s14 }
 0x1af   : > { %s1484_s14 = smov %s1270_s6  ;;  %s1485_s15 = smov %s1025_s16 }
 0x1b0   : > { %s1486_s16 = smov %s1029_s17  ;;  %s1487_s17 = smov %s1212_s5 }
 0x1b1   : > { %s1488_s18 = smov %s1041_s20  ;;  %s1489_s19 = smov %s1045_s21 }
 0x1b2   : > { %s1490_s20 = smov %s1480_s24  ;;  %21 = sbr.rel (!%p19_p13) target bundleno = 14 (0xe), region = 94 }
 0x1b3   : > { %s1491_s21 = smov %s1481_s0 }
 0x1b9   :  { %522 = vsyncpa [#allocation3], 1 }
 0x1ba   :  { %524 = vsyncpa [#allocation3 + $0x1], 1 }
 0x1bb   :  { %525 = vsyncpa [#allocation6], 1 }
 0x1bc   :  { %527 = vsyncpa [#allocation6 + $0x1], 1 }
 0x1bd   :  { %528 = vsyncpa [#allocation4], 1 }
 0x1be   :  { %530 = vsyncpa [#allocation4 + $0x1], 1 }

</bundles_post_ra>
